<compile_context>
chip_gen: v6e
topology: v6e:2x2x1
jax: 0.10.0
libtpu: 0.0.40
codegen_flags: <defaults>
</compile_context>

<pallas_src>
import math

import jax
import jax.numpy as jnp
from jax.experimental import pallas as pl
from jax.experimental.pallas import tpu as pltpu


# Logical dims of the module and their zero-padded, hardware-friendly sizes.
DIM_IN, DIM_HID, DIM_OUT = 5, 20, 16
K_PAD, H_PAD, N_PAD = 8, 32, 128  # input / hidden / output (lane-dense) padding


def _round_up(x, m):
    return (x + m - 1) // m * m


def mlp_kernel(x_ref, w1_ref, b1_ref, w2_ref, b2_ref, w3_ref, b3_ref, o_ref):
    # Layer 1: Linear(5 -> 20) + ReLU   (padded to 8 -> 32; pad lanes are exact zeros)
    h = jnp.dot(x_ref[...], w1_ref[...], preferred_element_type=jnp.float32)
    h = jnp.maximum(h + b1_ref[...], 0.0)
    # Layer 2: Linear(20 -> 20) + ReLU  (padded 32 -> 32)
    h = jnp.dot(h, w2_ref[...], preferred_element_type=jnp.float32)
    h = jnp.maximum(h + b2_ref[...], 0.0)
    # Output: Linear(20 -> 16), no activation (padded 32 -> 128, lane-dense store)
    o = jnp.dot(h, w3_ref[...], preferred_element_type=jnp.float32)
    o_ref[...] = o + b3_ref[...]


def _pad2d(a, rows, cols):
    return jnp.pad(a, ((0, rows - a.shape[0]), (0, cols - a.shape[1])))


def fc_network_forward(states, params, *, tile_b=1024):
    """states: (B, 5); params: dict of (in, out)-layout weights/biases. Returns (B, 16) f32."""
    x = jnp.asarray(states, dtype=jnp.float32)
    B = x.shape[0]

    # Zero-pad features/weights to aligned shapes (numerically exact).
    x = _pad2d(x, B, K_PAD)
    w1 = _pad2d(params["w1"].astype(jnp.float32), K_PAD, H_PAD)
    b1 = _pad2d(params["b1"].astype(jnp.float32), 1, H_PAD)
    w2 = _pad2d(params["w2"].astype(jnp.float32), H_PAD, H_PAD)
    b2 = _pad2d(params["b2"].astype(jnp.float32), 1, H_PAD)
    w3 = _pad2d(params["w3"].astype(jnp.float32), H_PAD, N_PAD)
    b3 = _pad2d(params["b3"].astype(jnp.float32), 1, N_PAD)

    # Batch tiling: tile_b in [8, 1024], multiple of 8; pad B up to a whole tile
    # so the last block never contains out-of-range rows (padded rows are sliced off).
    tile_b = max(8, min(int(tile_b), _round_up(B, 8)))
    tile_b = _round_up(tile_b, 8)
    b_pad = _round_up(B, tile_b)
    if b_pad != B:
        x = jnp.pad(x, ((0, b_pad - B), (0, 0)))
    grid = (b_pad // tile_b,)

    # Weights/biases: full-array blocks, constant index_map -> DMA'd once, resident in VMEM.
    def const_spec(arr):
        return pl.BlockSpec(arr.shape, lambda i: (0, 0))

    flops = 2 * B * (DIM_IN * DIM_HID + DIM_HID * DIM_HID + DIM_HID * DIM_OUT)
    weight_bytes = 4 * (DIM_IN * DIM_HID + DIM_HID + DIM_HID * DIM_HID + DIM_HID
                        + DIM_HID * DIM_OUT + DIM_OUT)
    bytes_accessed = 4 * B * (DIM_IN + DIM_OUT) + weight_bytes

    out_padded = pl.pallas_call(
        mlp_kernel,
        out_shape=jax.ShapeDtypeStruct((b_pad, N_PAD), jnp.float32),
        grid=grid,
        in_specs=[
            pl.BlockSpec((tile_b, K_PAD), lambda i: (i, 0)),  # x: streamed over batch
            const_spec(w1), const_spec(b1),
            const_spec(w2), const_spec(b2),
            const_spec(w3), const_spec(b3),
        ],
        out_specs=pl.BlockSpec((tile_b, N_PAD), lambda i: (i, 0)),
        compiler_params=pltpu.CompilerParams(
            dimension_semantics=("parallel",),
        ),
        cost_estimate=pl.CostEstimate(
            flops=flops, transcendentals=0, bytes_accessed=bytes_accessed
        ),
    )(x, w1, b1, w2, b2, w3, b3)

    return out_padded[:B, :DIM_OUT]


def init_params(key, layers=(20, 20), dim_input=DIM_IN, dim_output=DIM_OUT):
    """Deterministic init mimicking torch.nn.Linear default (uniform +/- 1/sqrt(fan_in))."""
    dims = [dim_input] + list(layers) + [dim_output]
    params = {}
    for idx in range(len(dims) - 1):
        fan_in, fan_out = dims[idx], dims[idx + 1]
        key, kw, kb = jax.random.split(key, 3)
        bound = 1.0 / math.sqrt(fan_in)
        # stored as (in, out) so the kernel does x @ W
        params[f"w{idx + 1}"] = jax.random.uniform(
            kw, (fan_in, fan_out), jnp.float32, -bound, bound
        )
        params[f"b{idx + 1}"] = jax.random.uniform(
            kb, (1, fan_out), jnp.float32, -bound, bound
        )
    return params


def reference_forward(states, params):
    h = jnp.maximum(states @ params["w1"] + params["b1"], 0.0)
    h = jnp.maximum(h @ params["w2"] + params["b2"], 0.0)
    return h @ params["w3"] + params["b3"]


if __name__ == "__main__":
    key = jax.random.PRNGKey(0)
    k_params, k_states = jax.random.split(key)

    params = init_params(k_params)
    # FCNetwork.forward takes raw `states` and casts to float32; batch=8, dim_input=5.
    states = jax.random.normal(k_states, (8, 5), dtype=jnp.float32)

    out = fc_network_forward(states, params)
    out = jax.block_until_ready(out)

    ref = reference_forward(states, params)
    assert out.shape == (8, 16) and out.dtype == jnp.float32
    assert jnp.allclose(out, ref, atol=1e-5, rtol=1e-5)

    # Also exercise a larger, non-tile-aligned batch to validate batch tiling + padding.
    k_big = jax.random.fold_in(k_states, 1)
    big_states = jax.random.normal(k_big, (2050, 5), dtype=jnp.float32)
    big_out = jax.block_until_ready(fc_network_forward(big_states, params))
    big_ref = reference_forward(big_states, params)
    assert big_out.shape == (2050, 16)
    assert jnp.allclose(big_out, big_ref, atol=1e-5, rtol=1e-5)

    print("KERNEL_OK")
</pallas_src>

<mosaic_0001>
module attributes {stable_mosaic.version = 11 : i64} {
  func.func @mlp_kernel(%arg0: i32, %arg1: memref<8x8xf32, #tpu.memory_space<vmem>>, %arg2: memref<8x32xf32, #tpu.memory_space<vmem>>, %arg3: memref<1x32xf32, #tpu.memory_space<vmem>>, %arg4: memref<32x32xf32, #tpu.memory_space<vmem>>, %arg5: memref<1x32xf32, #tpu.memory_space<vmem>>, %arg6: memref<32x128xf32, #tpu.memory_space<vmem>>, %arg7: memref<1x128xf32, #tpu.memory_space<vmem>>, %arg8: memref<8x128xf32, #tpu.memory_space<vmem>>) attributes {dimension_semantics = [#tpu.dimension_semantics<parallel>], iteration_bounds = array<i64: 1>, scalar_prefetch = 0 : i64, scratch_operands = 0 : i64, tpu.core_type = #tpu.core_type<tc>, window_params = [{transform_indices = @transform_0, window_bounds = array<i64: 8, 8>}, {pipeline_mode = #tpu.pipeline_mode<synchronous>, transform_indices = @transform_1, window_bounds = array<i64: 8, 32>}, {pipeline_mode = #tpu.pipeline_mode<synchronous>, transform_indices = @transform_2, window_bounds = array<i64: 1, 32>}, {pipeline_mode = #tpu.pipeline_mode<synchronous>, transform_indices = @transform_3, window_bounds = array<i64: 32, 32>}, {pipeline_mode = #tpu.pipeline_mode<synchronous>, transform_indices = @transform_4, window_bounds = array<i64: 1, 32>}, {pipeline_mode = #tpu.pipeline_mode<synchronous>, transform_indices = @transform_5, window_bounds = array<i64: 32, 128>}, {pipeline_mode = #tpu.pipeline_mode<synchronous>, transform_indices = @transform_6, window_bounds = array<i64: 1, 128>}, {transform_indices = @transform_7, window_bounds = array<i64: 8, 128>}]} {
    %c0 = arith.constant 0 : index
    %c0_0 = arith.constant 0 : index
    %0 = vector.load %arg1[%c0, %c0_0] : memref<8x8xf32, #tpu.memory_space<vmem>>, vector<8x8xf32>
    %c0_1 = arith.constant 0 : index
    %c0_2 = arith.constant 0 : index
    %1 = vector.load %arg2[%c0_1, %c0_2] : memref<8x32xf32, #tpu.memory_space<vmem>>, vector<8x32xf32>
    %cst = arith.constant dense<0.000000e+00> : vector<8x32xf32>
    %2 = tpu.matmul %0, %1, %cst {dimension_numbers = #tpu.dot_dimension_numbers<[1], [0], [0], [1], [0, 0, 1, 1], [], []>} : vector<8x8xf32>, vector<8x32xf32>, vector<8x32xf32> -> vector<8x32xf32>
    %c0_3 = arith.constant 0 : index
    %c0_4 = arith.constant 0 : index
    %3 = vector.load %arg3[%c0_3, %c0_4] : memref<1x32xf32, #tpu.memory_space<vmem>>, vector<1x32xf32>
    %4 = vector.broadcast %3 : vector<1x32xf32> to vector<8x32xf32>
    %5 = arith.addf %2, %4 : vector<8x32xf32>
    %cst_5 = arith.constant 0.000000e+00 : f32
    %6 = vector.broadcast %cst_5 : f32 to vector<8x32xf32>
    %7 = arith.maximumf %5, %6 : vector<8x32xf32>
    %c0_6 = arith.constant 0 : index
    %c0_7 = arith.constant 0 : index
    %8 = vector.load %arg4[%c0_6, %c0_7] : memref<32x32xf32, #tpu.memory_space<vmem>>, vector<32x32xf32>
    %cst_8 = arith.constant dense<0.000000e+00> : vector<8x32xf32>
    %9 = tpu.matmul %7, %8, %cst_8 {dimension_numbers = #tpu.dot_dimension_numbers<[1], [0], [0], [1], [0, 0, 1, 1], [], []>} : vector<8x32xf32>, vector<32x32xf32>, vector<8x32xf32> -> vector<8x32xf32>
    %c0_9 = arith.constant 0 : index
    %c0_10 = arith.constant 0 : index
    %10 = vector.load %arg5[%c0_9, %c0_10] : memref<1x32xf32, #tpu.memory_space<vmem>>, vector<1x32xf32>
    %11 = vector.broadcast %10 : vector<1x32xf32> to vector<8x32xf32>
    %12 = arith.addf %9, %11 : vector<8x32xf32>
    %cst_11 = arith.constant 0.000000e+00 : f32
    %13 = vector.broadcast %cst_11 : f32 to vector<8x32xf32>
    %14 = arith.maximumf %12, %13 : vector<8x32xf32>
    %c0_12 = arith.constant 0 : index
    %c0_13 = arith.constant 0 : index
    %15 = vector.load %arg6[%c0_12, %c0_13] : memref<32x128xf32, #tpu.memory_space<vmem>>, vector<32x128xf32>
    %cst_14 = arith.constant dense<0.000000e+00> : vector<8x128xf32>
    %16 = tpu.matmul %14, %15, %cst_14 {dimension_numbers = #tpu.dot_dimension_numbers<[1], [0], [0], [1], [0, 0, 1, 1], [], []>} : vector<8x32xf32>, vector<32x128xf32>, vector<8x128xf32> -> vector<8x128xf32>
    %c0_15 = arith.constant 0 : index
    %c0_16 = arith.constant 0 : index
    %17 = vector.load %arg7[%c0_15, %c0_16] : memref<1x128xf32, #tpu.memory_space<vmem>>, vector<1x128xf32>
    %18 = vector.broadcast %17 : vector<1x128xf32> to vector<8x128xf32>
    %19 = arith.addf %16, %18 : vector<8x128xf32>
    %c0_17 = arith.constant 0 : index
    %c0_18 = arith.constant 0 : index
    %20 = vector.load %arg8[%c0_17, %c0_18] : memref<8x128xf32, #tpu.memory_space<vmem>>, vector<8x128xf32>
    tpu.vector_store %arg8[%c0_17, %c0_18], %19 {strides = array<i32>} : memref<8x128xf32, #tpu.memory_space<vmem>>, vector<8x128xf32>,
    return
  }
  func.func @transform_0(%arg0: i32) -> (i32, i32) {
    %c0_i32 = arith.constant 0 : i32
    %c0_i32_0 = arith.constant 0 : i32
    return %arg0, %c0_i32 : i32, i32
  }
  func.func @transform_1(%arg0: i32) -> (i32, i32) {
    %c0_i32 = arith.constant 0 : i32
    %c0_i32_0 = arith.constant 0 : i32
    %c0_i32_1 = arith.constant 0 : i32
    return %c0_i32, %c0_i32_0 : i32, i32
  }
  func.func @transform_2(%arg0: i32) -> (i32, i32) {
    %c0_i32 = arith.constant 0 : i32
    %c0_i32_0 = arith.constant 0 : i32
    %c0_i32_1 = arith.constant 0 : i32
    return %c0_i32, %c0_i32_0 : i32, i32
  }
  func.func @transform_3(%arg0: i32) -> (i32, i32) {
    %c0_i32 = arith.constant 0 : i32
    %c0_i32_0 = arith.constant 0 : i32
    %c0_i32_1 = arith.constant 0 : i32
    return %c0_i32, %c0_i32_0 : i32, i32
  }
  func.func @transform_4(%arg0: i32) -> (i32, i32) {
    %c0_i32 = arith.constant 0 : i32
    %c0_i32_0 = arith.constant 0 : i32
    %c0_i32_1 = arith.constant 0 : i32
    return %c0_i32, %c0_i32_0 : i32, i32
  }
  func.func @transform_5(%arg0: i32) -> (i32, i32) {
    %c0_i32 = arith.constant 0 : i32
    %c0_i32_0 = arith.constant 0 : i32
    %c0_i32_1 = arith.constant 0 : i32
    return %c0_i32, %c0_i32_0 : i32, i32
  }
  func.func @transform_6(%arg0: i32) -> (i32, i32) {
    %c0_i32 = arith.constant 0 : i32
    %c0_i32_0 = arith.constant 0 : i32
    %c0_i32_1 = arith.constant 0 : i32
    return %c0_i32, %c0_i32_0 : i32, i32
  }
  func.func @transform_7(%arg0: i32) -> (i32, i32) {
    %c0_i32 = arith.constant 0 : i32
    %c0_i32_0 = arith.constant 0 : i32
    return %arg0, %c0_i32 : i32, i32
  }
}

</mosaic_0001>

<bundles_post_ra>
// kernel: tpu_custom_call.1
= control target key start
LH: loop header
LB: loop body
LE: loop exit
PB: predicated region body
PF: predicated region fallthrough
CT: control target
= control target key end

     0   :  { %12 = vsyncpa [#allocation3], 0  ;;  %s587_s0 = inlined_call_operand.hbm [shape: f32[8,8], index: 0, kind: input, shape index: {}]   ;;  %s588_s1 = inlined_call_operand.hbm [shape: f32[8,32], index: 1, kind: input, shape index: {}]   ;;  %s589_s2 = inlined_call_operand.vmem [shape: f32[1,32], index: 2, kind: input, shape index: {}]   ;;  %s590_s3 = inlined_call_operand.hbm [shape: f32[32,32], index: 3, kind: input, shape index: {}]   ;;  %s591_s4 = inlined_call_operand.vmem [shape: f32[1,32], index: 4, kind: input, shape index: {}]   ;;  %s592_s5 = inlined_call_operand.hbm [shape: f32[32,128], index: 5, kind: input, shape index: {}]   ;;  %s593_s6 = inlined_call_operand.vmem [shape: f32[1,128], index: 6, kind: input, shape index: {}]   ;;  %s594_s7 = inlined_call_operand.hbm [shape: f32[8,128], index: 7, kind: output, shape index: {}]  }
   0x1   :  { %13 = vsyncpa [#allocation6], 0 }
   0x2   :  { %14 = vsyncpa [#allocation9], 0 }
   0x3   :  { %15 = vsyncpa [#allocation4], 0  ;;  %s512_s24 = smov [#allocation5]   ;;  %s513_s26 = smov [#allocation2]  }
   0x4   :  { %s32_s25 = sshll.u32 %s512_s24, 4  ;;  %s22_s27 = sshll.u32 %s513_s26, 4  ;;  %s33_s25 = int_to_ptr.vmem [resolvable:$true] %s32_s25  ;;  %s23_s27 = int_to_ptr.vmem [resolvable:$true] %s22_s27 }
   0x5   :  { %s412_s28 = scalar_lea.vmem %s33_s25, 128  ;;  %p417_p1 = scmp.lt.s32.totalorder %s33_s25, %s33_s25 }
   0x6   :  { %p413_p0 = scmp.ne.s32.totalorder %s33_s25, %s412_s28  ;;  %p418_p2 = scmp.lt.s32.totalorder %s412_s28, %s412_s28 }
   0x8   :  { %p419_p3 = por %p418_p2, %p417_p1 }
   0xa   :  { %p420_p4 = pnand %p419_p3, %p413_p0 }
   0xc   :  { %423 = shalt.err (!%p420_p4)
}
   0xd   :  { %35 = dma.hbm_to_vmem [thread:$0]  %s588_s1, 128, %s33_s25, [#allocation6]  }
   0xe   :  { %s432_s8 = scalar_lea.vmem %s23_s27, 128  ;;  %p437_p6 = scmp.lt.s32.totalorder %s23_s27, %s23_s27 }
   0xf   :  { %p433_p5 = scmp.ne.s32.totalorder %s23_s27, %s432_s8  ;;  %p438_p7 = scmp.lt.s32.totalorder %s432_s8, %s432_s8 }
  0x11   :  { %p439_p8 = por %p438_p7, %p437_p6 }
  0x13   :  { %p440_p9 = pnand %p439_p8, %p433_p5 }
  0x15   :  { %443 = shalt.err (!%p440_p9)
}
  0x16   :  { %25 = dma.hbm_to_vmem [thread:$0]  %s587_s0, 128, %s23_s27, [#allocation3]  }
  0x17   :  { %s514_s11 = smov [#allocation7]  }
  0x18   :  { %s43_s12 = sshll.u32 %s514_s11, 4  ;;  %s44_s12 = int_to_ptr.vmem [resolvable:$true] %s43_s12 }
  0x19   :  { %s452_s13 = scalar_lea.vmem %s44_s12, 512  ;;  %p457_p11 = scmp.lt.s32.totalorder %s44_s12, %s44_s12 }
  0x1a   :  { %p453_p10 = scmp.ne.s32.totalorder %s44_s12, %s452_s13  ;;  %p458_p12 = scmp.lt.s32.totalorder %s452_s13, %s452_s13 }
  0x1c   :  { %p459_p13 = por %p458_p12, %p457_p11 }
  0x1e   :  { %p460_p0 = pnand %p459_p13, %p453_p10 }
  0x20   :  { %463 = shalt.err (!%p460_p0)
}
  0x21   :  { %s515_s1 = smov 128   ;;  %s516_s14 = smov 8  }
  0x22   :  { %49 = dma.hbm_to_vmem [thread:$0]  %s590_s3, 512, %s44_s12, [#allocation6], %s515_s1, %s515_s1, %s516_s14  }
  0x23   :  { %s517_s17 = smov [#allocation8]  }
  0x24   :  { %s57_s18 = sshll.u32 %s517_s17, 4  ;;  %s58_s18 = int_to_ptr.vmem [resolvable:$true] %s57_s18 }
  0x25   :  { %s472_s0 = scalar_lea.vmem %s58_s18, 512  ;;  %p477_p2 = scmp.lt.s32.totalorder %s58_s18, %s58_s18 }
  0x26   :  { %p473_p1 = scmp.ne.s32.totalorder %s58_s18, %s472_s0  ;;  %p478_p3 = scmp.lt.s32.totalorder %s472_s0, %s472_s0 }
  0x28   :  { %p479_p4 = por %p478_p3, %p477_p2 }
  0x2a   :  { %p480_p5 = pnand %p479_p4, %p473_p1 }
  0x2c   :  { %483 = shalt.err (!%p480_p5)
}
  0x2d   :  { %63 = dma.hbm_to_vmem [thread:$0]  %s592_s5, 512, %s58_s18, [#allocation9], %s515_s1, %s515_s1, %s516_s14  }
  0x2e   :  { %504 = dma.done.wait [#allocation3], 128  }
  0x2f   :  { %505 = vsyncadd [#allocation3], 4294967168 }
  0x30   :  { %506 = dma.done.wait [#allocation6], 640  }
  0x31   :  { %507 = vsyncadd [#allocation6], 4294966656 }
  0x32   :  { %508 = dma.done.wait [#allocation9], 512  }
  0x33   :  { %509 = vsyncadd [#allocation9], 4294966784  ;;  %v518_v0 = vmov 0.0   ;;  %vm519_vm0 = vmmov 0   ;;  %vm87_vm1 = vcmask 64512   ;;  %v79_v1 = vld [vmem:[#allocation5] sm:$0xff] }
  0x34   :  { %368 = vmatprep.subr.mxu0 %v518_v0  ;;  %370 = vmatprep.mubr.msk.f32.mxu0 %vm519_vm0, %v518_v0  ;;  %v78_v2 = vld [vmem:[#allocation2] sm:$0xff]  ;;  %v165_v3 = vld [vmem:[#allocation7 + $0x18] sm:$0xff]  ;;  %v163_v5 = vld [vmem:[#allocation7 + $0x8] sm:$0xff]  ;;  %vm173_vm2 = vcmask 261120   ;;  %s520_s24 = smov [#allocation10]  }
  0x35   :  { %373 = vmatprep.subr.mxu1 %v518_v0  ;;  %381 = vmatprep.mubr.msk.f32.mxu1 %vm519_vm0, %v518_v0  ;;  %v164_v4 = vld [vmem:[#allocation7 + $0x10] sm:$0xff]  ;;  %v162_v6 = vld [vmem:[#allocation7] sm:$0xff]  ;;  %v251_v7 = vld [vmem:[#allocation8 + $0x18] sm:$0xff]  ;;  %s339_s25 = sshll.u32 %s520_s24, 4  ;;  %s340_s25 = int_to_ptr.vmem [resolvable:$true] %s339_s25 }
  0x36   :  { %369 = vmatpush3.msra.mxu0 %v79_v1  ;;  %374 = vmatpush3.msra.mxu1 %v165_v3  ;;  %v350_v8 = vld [vmem:[%s589_s2] ss:$0 sm:$0xff]  ;;  %v249_v14 = vld [vmem:[#allocation8 + $0x8] sm:$0xff]  ;;  %v248_v15 = vld [vmem:[#allocation8] sm:$0xff]  ;;  %s484_s26 = scalar_lea.vmem %s340_s25, 128  ;;  %p489_p7 = scmp.lt.s32.totalorder %s340_s25, %s340_s25 }
  0x37   :  { %371 = vmatmul.mubr.msk.f32.vlgmr.msra.gmra.mxu0 %vm87_vm1, %v78_v2  ;;  %375 = vmatprep.subr.mxu1 %v518_v0  ;;  %v250_v13 = vld [vmem:[#allocation8 + $0x10] sm:$0xff]  ;;  %p485_p6 = scmp.ne.s32.totalorder %s340_s25, %s484_s26  ;;  %p490_p8 = scmp.lt.s32.totalorder %s484_s26, %s484_s26 }
  0x38   :  { %384 = vmatprep.subr.mxu0 %v518_v0  ;;  %392 = vmatprep.mubr.msk.f32.mxu0 %vm519_vm0, %v518_v0  ;;  %v352_v16 = vld [vmem:[%s591_s4] ss:$0 sm:$0xff] }
  0x39   :  { %376 = vmatpush3.msra.mxu1 %v164_v4  ;;  %385 = vmatpush3.msra.mxu0 %v251_v7  ;;  %v354_v21 = vld [vmem:[%s593_s6] ss:$0 sm:$0xff]  ;;  %p491_p9 = por %p490_p8, %p489_p7 }
  0x3a   :  { %377 = vmatprep.subr.mxu1 %v518_v0  ;;  %386 = vmatprep.subr.mxu0 %v518_v0 }
  0x3b   :  { %378 = vmatpush3.msra.mxu1 %v163_v5  ;;  %387 = vmatpush3.msra.mxu0 %v250_v13  ;;  %p492_p10 = pnand %p491_p9, %p485_p6 }
  0x3c   :  { %379 = vmatprep.subr.mxu1 %v518_v0  ;;  %388 = vmatprep.subr.mxu0 %v518_v0 }
  0x3d   :  { %380 = vmatpush3.msra.mxu1 %v162_v6  ;;  %389 = vmatpush3.msra.mxu0 %v249_v14 }
  0x3e   :  { %390 = vmatprep.subr.mxu0 %v518_v0 }
  0x3f   :  { %391 = vmatpush3.msra.mxu0 %v248_v15 }
  0xf7   :  { %v157_v9 = vpop.f32.mrf.mxu0 }
  0xf8   :  { %v158_v10 = vadd.f32 %v350_v8, %v157_v9 }
  0xf9   :  { %v372_v11 = vpop.f32.mrf.mxu0 }
  0xfa   :  { %v161_v12 = vmax.f32 %v158_v10, 0.0 }
  0xfc   :  { %382 = vmatmul.mubr.msk.f32.vlgmr.msra.gmra.mxu1 %vm173_vm2, %v161_v12 }
 0x1bc   :  { %v243_v17 = vpop.f32.mrf.mxu1 }
 0x1bd   :  { %v244_v18 = vadd.f32 %v352_v16, %v243_v17 }
 0x1be   :  { %v383_v19 = vpop.f32.mrf.mxu1 }
 0x1bf   :  { %v247_v20 = vmax.f32 %v244_v18, 0.0 }
 0x1c1   :  { %393 = vmatmul.mubr.msk.f32.vlgmr.msra.gmra.mxu0 %vm173_vm2, %v247_v20 }
 0x281   :  { %v328_v22 = vpop.f32.mrf.mxu0 }
 0x282   :  { %v329_v23 = vadd.f32 %v354_v21, %v328_v22 }
 0x283   :  { %v394_v24 = vpop.f32.mrf.mxu0 }
 0x284   :  { %332 = vst [vmem:[#allocation10] sm:$0xff] %v329_v23 }
 0x285   :  { %495 = shalt.err (!%p492_p10)
}
 0x286   :  { %342 = dma.vmem_to_hbm [thread:$0]  %s340_s25, 128, %s594_s7, [#allocation4]  }
 0x287   :  { %510 = dma.done.wait [#allocation4], 128  }
 0x288   :  { %511 = vsyncadd [#allocation4], 4294967168 }
 0x289   :  { %346 = vsyncpa [#allocation3], 1 }
 0x28a   :  { %347 = vsyncpa [#allocation6], 1 }
 0x28b   :  { %348 = vsyncpa [#allocation9], 1 }
 0x28c   :  { %349 = vsyncpa [#allocation4], 1 }

</bundles_post_ra>
